<compile_context>
chip_gen: v7x
topology: tpu7x:2x2x1
jax: 0.10.0
libtpu: 0.0.40
codegen_flags: <defaults>
</compile_context>

<pallas_src>
import math

import jax
import jax.numpy as jnp
from jax.experimental import pallas as pl
from jax.experimental.pallas import tpu as pltpu

LAYER_SIZES = [(1, 20), (20, 64), (64, 128), (128, 64), (64, 1)]  # (in, out)


def mlp_kernel(x_ref,
               w1_ref, b1_ref,
               w2_ref, b2_ref,
               w3_ref, b3_ref,
               w4_ref, b4_ref,
               w5_ref, b5_ref,
               o_ref):
    # Lane-dense transposed layout: activations are (features, batch_tile).
    x = x_ref[...]                                     # (1, TB)

    # Layer 1: Linear(1 -> 20).  K == 1 => outer product; broadcast multiply on
    # the VPU instead of paying MXU push/drain for zero systolic work.
    h = w1_ref[...] * x + b1_ref[...]                  # (20,1)*(1,TB) -> (20, TB)
    h = jnp.maximum(h, 0.0)

    # Layers 2-4: real contractions -> MXU, f32 accumulation.  (f32 operands kept
    # so the demo's 1e-5 atol holds; cast to bf16 here on v6e/v7x if tolerable.)
    h = jnp.dot(w2_ref[...], h, preferred_element_type=jnp.float32) + b2_ref[...]
    h = jnp.maximum(h, 0.0)                            # (64, TB)

    h = jnp.dot(w3_ref[...], h, preferred_element_type=jnp.float32) + b3_ref[...]
    h = jnp.maximum(h, 0.0)                            # (128, TB)

    h = jnp.dot(w4_ref[...], h, preferred_element_type=jnp.float32) + b4_ref[...]
    h = jnp.maximum(h, 0.0)                            # (64, TB)

    # Layer 5: Linear(64 -> 1).  Single output row => elementwise multiply +
    # cross-sublane reduction (VPU + XLU); MXU push cadence is the scarcer slot.
    out = jnp.sum(w5_ref[...] * h, axis=0, keepdims=True) + b5_ref[...]  # (1, TB)

    o_ref[...] = out.astype(o_ref.dtype)


def _round_up(v, m):
    return -(-v // m) * m


def line_forward(x, params, *, batch_tile=4096):
    """x: (B, 1) float32.
    params: [(W, b), ...] in PyTorch layout, W: (out, in), b: (out,)."""
    B = x.shape[0]

    # Tile selection:
    #   * as large as possible (per-grid-step overhead dominates small tiles),
    #   * but <= ~ceil(B/2) rounded up to 128 so the grid has >= 2 parallel
    #     steps when B allows (two TensorCores on v7x),
    #   * capped at batch_tile so activations fit v5e's scoped VMEM comfortably.
    tb = min(batch_tile, max(128, _round_up(-(-B // 2), 128)))
    grid_steps = pl.cdiv(B, tb)

    # Lane-dense layout, no padded copy: (B,1) -> (1,B) is a free reshape; the
    # ragged last block is masked by Pallas (columns are independent).
    xt = x.reshape(1, B)

    (w1, b1), (w2, b2), (w3, b3), (w4, b4), (w5, b5) = params
    # Kernel operand layouts:
    #   layer 1 : w1 (20, 1), b1 (20, 1)          (outer product on VPU)
    #   layer 2-4: Wi (out, in), bi (out, 1)      (MXU: W @ h)
    #   layer 5 : w5 as (64, 1) column, b5 (1, 1) (multiply + sublane reduce)
    flat = [
        w1, b1.reshape(-1, 1),
        w2, b2.reshape(-1, 1),
        w3, b3.reshape(-1, 1),
        w4, b4.reshape(-1, 1),
        w5.reshape(-1, 1), b5.reshape(1, 1),
    ]

    # Weights/biases: full-array blocks with a constant index_map -> DMA'd once
    # and kept VMEM-resident across every batch grid step.
    def const_spec(arr):
        return pl.BlockSpec(arr.shape, lambda i: (0, 0))

    in_specs = ([pl.BlockSpec((1, tb), lambda i: (0, i))]
                + [const_spec(a) for a in flat])
    out_spec = pl.BlockSpec((1, tb), lambda i: (0, i))

    padded_cols = grid_steps * tb
    flops = 2 * padded_cols * sum(fi * fo for fi, fo in LAYER_SIZES)
    bytes_accessed = 4 * (2 * B + sum(int(a.size) for a in flat))

    out_t = pl.pallas_call(
        mlp_kernel,
        out_shape=jax.ShapeDtypeStruct((1, B), jnp.float32),
        grid=(grid_steps,),
        in_specs=in_specs,
        out_specs=out_spec,
        compiler_params=pltpu.CompilerParams(
            dimension_semantics=("parallel",),     # shard batch tiles across TCs
            vmem_limit_bytes=32 * 1024 * 1024),    # headroom for big tiles on v5e
        cost_estimate=pl.CostEstimate(
            flops=flops, transcendentals=0, bytes_accessed=bytes_accessed),
    )(xt, *flat)

    # Back to PyTorch convention (B, 1).
    return out_t.reshape(B, 1)


def init_params(key):
    """Deterministic init mirroring torch.nn.Linear default U[-1/sqrt(fan_in), +],
    in PyTorch layout: W (out, in), b (out,)."""
    params = []
    for fan_in, fan_out in LAYER_SIZES:
        key, kw, kb = jax.random.split(key, 3)
        bound = 1.0 / math.sqrt(fan_in)
        w = jax.random.uniform(kw, (fan_out, fan_in), jnp.float32, -bound, bound)
        b = jax.random.uniform(kb, (fan_out,), jnp.float32, -bound, bound)
        params.append((w, b))
    return params


def reference_forward(x, params):
    h = x
    for i, (w, b) in enumerate(params):
        h = h @ w.T + b
        if i < len(params) - 1:
            h = jnp.maximum(h, 0.0)
    return h


if __name__ == "__main__":
    key = jax.random.PRNGKey(0)
    params = init_params(key)

    # Small demo batch (single grid step, ragged lane block).
    key, kx = jax.random.split(key)
    B = 8
    x = jax.random.normal(kx, (B, 1), dtype=jnp.float32)
    out = jax.block_until_ready(line_forward(x, params))
    ref = reference_forward(x, params)
    assert out.shape == (B, 1), out.shape
    assert jnp.allclose(out, ref, atol=1e-5, rtol=1e-4), (out, ref)

    # Slightly larger batch to exercise the 2-step parallel grid + masked edge.
    key, kx2 = jax.random.split(key)
    B2 = 300
    x2 = jax.random.normal(kx2, (B2, 1), dtype=jnp.float32)
    out2 = jax.block_until_ready(line_forward(x2, params))
    ref2 = reference_forward(x2, params)
    assert out2.shape == (B2, 1), out2.shape
    assert jnp.allclose(out2, ref2, atol=1e-5, rtol=1e-4)

    print("KERNEL_OK")
</pallas_src>

<mosaic_0001>
module attributes {stable_mosaic.version = 11 : i64} {
  func.func @mlp_kernel(%arg0: i32, %arg1: memref<1x128xf32, #tpu.memory_space<vmem>>, %arg2: memref<20x1xf32, #tpu.memory_space<vmem>>, %arg3: memref<20x1xf32, #tpu.memory_space<vmem>>, %arg4: memref<64x20xf32, #tpu.memory_space<vmem>>, %arg5: memref<64x1xf32, #tpu.memory_space<vmem>>, %arg6: memref<128x64xf32, #tpu.memory_space<vmem>>, %arg7: memref<128x1xf32, #tpu.memory_space<vmem>>, %arg8: memref<64x128xf32, #tpu.memory_space<vmem>>, %arg9: memref<64x1xf32, #tpu.memory_space<vmem>>, %arg10: memref<64x1xf32, #tpu.memory_space<vmem>>, %arg11: memref<1x1xf32, #tpu.memory_space<vmem>>, %arg12: memref<1x128xf32, #tpu.memory_space<vmem>>) attributes {dimension_semantics = [#tpu.dimension_semantics<parallel>], iteration_bounds = array<i64: 1>, scalar_prefetch = 0 : i64, scratch_operands = 0 : i64, tpu.core_type = #tpu.core_type<tc>, window_params = [{transform_indices = @transform_0, window_bounds = array<i64: 1, 128>}, {pipeline_mode = #tpu.pipeline_mode<synchronous>, transform_indices = @transform_1, window_bounds = array<i64: 20, 1>}, {pipeline_mode = #tpu.pipeline_mode<synchronous>, transform_indices = @transform_2, window_bounds = array<i64: 20, 1>}, {pipeline_mode = #tpu.pipeline_mode<synchronous>, transform_indices = @transform_3, window_bounds = array<i64: 64, 20>}, {pipeline_mode = #tpu.pipeline_mode<synchronous>, transform_indices = @transform_4, window_bounds = array<i64: 64, 1>}, {pipeline_mode = #tpu.pipeline_mode<synchronous>, transform_indices = @transform_5, window_bounds = array<i64: 128, 64>}, {pipeline_mode = #tpu.pipeline_mode<synchronous>, transform_indices = @transform_6, window_bounds = array<i64: 128, 1>}, {pipeline_mode = #tpu.pipeline_mode<synchronous>, transform_indices = @transform_7, window_bounds = array<i64: 64, 128>}, {pipeline_mode = #tpu.pipeline_mode<synchronous>, transform_indices = @transform_8, window_bounds = array<i64: 64, 1>}, {pipeline_mode = #tpu.pipeline_mode<synchronous>, transform_indices = @transform_9, window_bounds = array<i64: 64, 1>}, {pipeline_mode = #tpu.pipeline_mode<synchronous>, transform_indices = @transform_10, window_bounds = array<i64: 1, 1>}, {transform_indices = @transform_11, window_bounds = array<i64: 1, 128>}]} {
    %c0 = arith.constant 0 : index
    %c0_0 = arith.constant 0 : index
    %0 = vector.load %arg1[%c0, %c0_0] : memref<1x128xf32, #tpu.memory_space<vmem>>, vector<1x128xf32>
    %c0_1 = arith.constant 0 : index
    %c0_2 = arith.constant 0 : index
    %1 = vector.load %arg2[%c0_1, %c0_2] : memref<20x1xf32, #tpu.memory_space<vmem>>, vector<20x1xf32>
    %2 = vector.broadcast %1 : vector<20x1xf32> to vector<20x128xf32>
    %3 = vector.broadcast %0 : vector<1x128xf32> to vector<20x128xf32>
    %4 = arith.mulf %2, %3 : vector<20x128xf32>
    %c0_3 = arith.constant 0 : index
    %c0_4 = arith.constant 0 : index
    %5 = vector.load %arg3[%c0_3, %c0_4] : memref<20x1xf32, #tpu.memory_space<vmem>>, vector<20x1xf32>
    %6 = vector.broadcast %5 : vector<20x1xf32> to vector<20x128xf32>
    %7 = arith.addf %4, %6 : vector<20x128xf32>
    %cst = arith.constant 0.000000e+00 : f32
    %8 = vector.broadcast %cst : f32 to vector<20x128xf32>
    %9 = arith.maximumf %7, %8 : vector<20x128xf32>
    %c0_5 = arith.constant 0 : index
    %c0_6 = arith.constant 0 : index
    %10 = vector.load %arg4[%c0_5, %c0_6] : memref<64x20xf32, #tpu.memory_space<vmem>>, vector<64x20xf32>
    %cst_7 = arith.constant dense<0.000000e+00> : vector<64x128xf32>
    %11 = tpu.matmul %10, %9, %cst_7 {dimension_numbers = #tpu.dot_dimension_numbers<[1], [0], [0], [1], [0, 0, 1, 1], [], []>} : vector<64x20xf32>, vector<20x128xf32>, vector<64x128xf32> -> vector<64x128xf32>
    %c0_8 = arith.constant 0 : index
    %c0_9 = arith.constant 0 : index
    %12 = vector.load %arg5[%c0_8, %c0_9] : memref<64x1xf32, #tpu.memory_space<vmem>>, vector<64x1xf32>
    %13 = vector.broadcast %12 : vector<64x1xf32> to vector<64x128xf32>
    %14 = arith.addf %11, %13 : vector<64x128xf32>
    %cst_10 = arith.constant 0.000000e+00 : f32
    %15 = vector.broadcast %cst_10 : f32 to vector<64x128xf32>
    %16 = arith.maximumf %14, %15 : vector<64x128xf32>
    %c0_11 = arith.constant 0 : index
    %c0_12 = arith.constant 0 : index
    %17 = vector.load %arg6[%c0_11, %c0_12] : memref<128x64xf32, #tpu.memory_space<vmem>>, vector<128x64xf32>
    %cst_13 = arith.constant dense<0.000000e+00> : vector<128x128xf32>
    %18 = tpu.matmul %17, %16, %cst_13 {dimension_numbers = #tpu.dot_dimension_numbers<[1], [0], [0], [1], [0, 0, 1, 1], [], []>} : vector<128x64xf32>, vector<64x128xf32>, vector<128x128xf32> -> vector<128x128xf32>
    %c0_14 = arith.constant 0 : index
    %c0_15 = arith.constant 0 : index
    %19 = vector.load %arg7[%c0_14, %c0_15] : memref<128x1xf32, #tpu.memory_space<vmem>>, vector<128x1xf32>
    %20 = vector.broadcast %19 : vector<128x1xf32> to vector<128x128xf32>
    %21 = arith.addf %18, %20 : vector<128x128xf32>
    %cst_16 = arith.constant 0.000000e+00 : f32
    %22 = vector.broadcast %cst_16 : f32 to vector<128x128xf32>
    %23 = arith.maximumf %21, %22 : vector<128x128xf32>
    %c0_17 = arith.constant 0 : index
    %c0_18 = arith.constant 0 : index
    %24 = vector.load %arg8[%c0_17, %c0_18] : memref<64x128xf32, #tpu.memory_space<vmem>>, vector<64x128xf32>
    %cst_19 = arith.constant dense<0.000000e+00> : vector<64x128xf32>
    %25 = tpu.matmul %24, %23, %cst_19 {dimension_numbers = #tpu.dot_dimension_numbers<[1], [0], [0], [1], [0, 0, 1, 1], [], []>} : vector<64x128xf32>, vector<128x128xf32>, vector<64x128xf32> -> vector<64x128xf32>
    %c0_20 = arith.constant 0 : index
    %c0_21 = arith.constant 0 : index
    %26 = vector.load %arg9[%c0_20, %c0_21] : memref<64x1xf32, #tpu.memory_space<vmem>>, vector<64x1xf32>
    %27 = vector.broadcast %26 : vector<64x1xf32> to vector<64x128xf32>
    %28 = arith.addf %25, %27 : vector<64x128xf32>
    %cst_22 = arith.constant 0.000000e+00 : f32
    %29 = vector.broadcast %cst_22 : f32 to vector<64x128xf32>
    %30 = arith.maximumf %28, %29 : vector<64x128xf32>
    %c0_23 = arith.constant 0 : index
    %c0_24 = arith.constant 0 : index
    %31 = vector.load %arg10[%c0_23, %c0_24] : memref<64x1xf32, #tpu.memory_space<vmem>>, vector<64x1xf32>
    %32 = vector.broadcast %31 : vector<64x1xf32> to vector<64x128xf32>
    %33 = arith.mulf %32, %30 : vector<64x128xf32>
    %cst_25 = arith.constant dense<0.000000e+00> : vector<128xf32>
    %34 = vector.multi_reduction <add>, %33, %cst_25 [0] : vector<64x128xf32> to vector<128xf32>
    %35 = vector.shape_cast %34 : vector<128xf32> to vector<1x128xf32>
    %c0_26 = arith.constant 0 : index
    %c0_27 = arith.constant 0 : index
    %36 = vector.load %arg11[%c0_26, %c0_27] : memref<1x1xf32, #tpu.memory_space<vmem>>, vector<1x1xf32>
    %37 = vector.broadcast %36 : vector<1x1xf32> to vector<1x128xf32>
    %38 = arith.addf %35, %37 : vector<1x128xf32>
    %c0_28 = arith.constant 0 : index
    %c0_29 = arith.constant 0 : index
    %39 = vector.load %arg12[%c0_28, %c0_29] : memref<1x128xf32, #tpu.memory_space<vmem>>, vector<1x128xf32>
    tpu.vector_store %arg12[%c0_28, %c0_29], %38 {strides = array<i32>} : memref<1x128xf32, #tpu.memory_space<vmem>>, vector<1x128xf32>,
    return
  }
  func.func @transform_0(%arg0: i32) -> (i32, i32) {
    %c0_i32 = arith.constant 0 : i32
    %c0_i32_0 = arith.constant 0 : i32
    return %c0_i32, %arg0 : i32, i32
  }
  func.func @transform_1(%arg0: i32) -> (i32, i32) {
    %c0_i32 = arith.constant 0 : i32
    %c0_i32_0 = arith.constant 0 : i32
    %c0_i32_1 = arith.constant 0 : i32
    return %c0_i32, %c0_i32_0 : i32, i32
  }
  func.func @transform_2(%arg0: i32) -> (i32, i32) {
    %c0_i32 = arith.constant 0 : i32
    %c0_i32_0 = arith.constant 0 : i32
    %c0_i32_1 = arith.constant 0 : i32
    return %c0_i32, %c0_i32_0 : i32, i32
  }
  func.func @transform_3(%arg0: i32) -> (i32, i32) {
    %c0_i32 = arith.constant 0 : i32
    %c0_i32_0 = arith.constant 0 : i32
    %c0_i32_1 = arith.constant 0 : i32
    return %c0_i32, %c0_i32_0 : i32, i32
  }
  func.func @transform_4(%arg0: i32) -> (i32, i32) {
    %c0_i32 = arith.constant 0 : i32
    %c0_i32_0 = arith.constant 0 : i32
    %c0_i32_1 = arith.constant 0 : i32
    return %c0_i32, %c0_i32_0 : i32, i32
  }
  func.func @transform_5(%arg0: i32) -> (i32, i32) {
    %c0_i32 = arith.constant 0 : i32
    %c0_i32_0 = arith.constant 0 : i32
    %c0_i32_1 = arith.constant 0 : i32
    return %c0_i32, %c0_i32_0 : i32, i32
  }
  func.func @transform_6(%arg0: i32) -> (i32, i32) {
    %c0_i32 = arith.constant 0 : i32
    %c0_i32_0 = arith.constant 0 : i32
    %c0_i32_1 = arith.constant 0 : i32
    return %c0_i32, %c0_i32_0 : i32, i32
  }
  func.func @transform_7(%arg0: i32) -> (i32, i32) {
    %c0_i32 = arith.constant 0 : i32
    %c0_i32_0 = arith.constant 0 : i32
    %c0_i32_1 = arith.constant 0 : i32
    return %c0_i32, %c0_i32_0 : i32, i32
  }
  func.func @transform_8(%arg0: i32) -> (i32, i32) {
    %c0_i32 = arith.constant 0 : i32
    %c0_i32_0 = arith.constant 0 : i32
    %c0_i32_1 = arith.constant 0 : i32
    return %c0_i32, %c0_i32_0 : i32, i32
  }
  func.func @transform_9(%arg0: i32) -> (i32, i32) {
    %c0_i32 = arith.constant 0 : i32
    %c0_i32_0 = arith.constant 0 : i32
    %c0_i32_1 = arith.constant 0 : i32
    return %c0_i32, %c0_i32_0 : i32, i32
  }
  func.func @transform_10(%arg0: i32) -> (i32, i32) {
    %c0_i32 = arith.constant 0 : i32
    %c0_i32_0 = arith.constant 0 : i32
    %c0_i32_1 = arith.constant 0 : i32
    return %c0_i32, %c0_i32_0 : i32, i32
  }
  func.func @transform_11(%arg0: i32) -> (i32, i32) {
    %c0_i32 = arith.constant 0 : i32
    %c0_i32_0 = arith.constant 0 : i32
    return %c0_i32, %arg0 : i32, i32
  }
}

</mosaic_0001>

<bundles_post_ra>
// kernel: tpu_custom_call.1
= control target key start
LH: loop header
LB: loop body
LE: loop exit
PB: predicated region body
PF: predicated region fallthrough
CT: control target
= control target key end

     0   :  { %s1482_s0 = inlined_call_operand.vmem [shape: f32[1,8], index: 0, kind: input, shape index: {}]   ;;  %s1483_s1 = inlined_call_operand.vmem [shape: f32[20,1], index: 1, kind: input, shape index: {}]   ;;  %s1484_s2 = inlined_call_operand.vmem [shape: f32[20,1], index: 2, kind: input, shape index: {}]   ;;  %s1485_s3 = inlined_call_operand.vmem [shape: f32[64,20], index: 3, kind: input, shape index: {}]   ;;  %s1486_s4 = inlined_call_operand.vmem [shape: f32[64,1], index: 4, kind: input, shape index: {}]   ;;  %s1487_s5 = inlined_call_operand.vmem [shape: f32[128,64], index: 5, kind: input, shape index: {}]   ;;  %s1488_s6 = inlined_call_operand.vmem [shape: f32[128,1], index: 6, kind: input, shape index: {}]   ;;  %s1489_s7 = inlined_call_operand.vmem [shape: f32[64,128], index: 7, kind: input, shape index: {}]   ;;  %s1490_s8 = inlined_call_operand.vmem [shape: f32[64,1], index: 8, kind: input, shape index: {}]   ;;  %s1491_s9 = inlined_call_operand.vmem [shape: f32[64,1], index: 9, kind: input, shape index: {}]   ;;  %s1492_s10 = inlined_call_operand.<no memory space> [shape: f32[1,1], index: 10, kind: input, shape index: {}]   ;;  %s1493_s11 = inlined_call_operand.hbm [shape: f32[1,8], index: 11, kind: output, shape index: {}]  }
   0x1   :  { %v16_v0 = vstv %s1492_s10 }
   0x2   :  { %17 = vst [vmem:[#allocation2] sm:$0x1] %v16_v0 }
   0x3   :  { %v69_v1 = vld [vmem:[%s1484_s2] sm:$0xff]  ;;  %v1144_v3 = vmov 0   ;;  %v70_v4 = vld [vmem:[%s1484_s2 + $0x8] sm:$0xff]  ;;  %v71_v6 = vld [vmem:[%s1484_s2 + $0x10] sm:$0xf] }
   0x4   :  { %v42_v2 = vld [vmem:[%s1483_s1] sm:$0xff]  ;;  %1119 = vset.pattern.permute.xlu1 %v1144_v3  ;;  %1118 = vset.pattern.permute.xlu0 %v1144_v3  ;;  %v43_v5 = vld [vmem:[%s1483_s1 + $0x8] sm:$0xff]  ;;  %v44_v7 = vld [vmem:[%s1483_s1 + $0x10] sm:$0xf] }
   0x5   :  { %74 = vperm.xlu1 %1119, %v69_v1   ;;  %47 = vperm.xlu0 %1118, %v42_v2   ;;  %v102_v8 = vld [vmem:[%s1486_s4 + $0x8] sm:$0xff]  ;;  %v101_v9 = vld [vmem:[%s1486_s4] sm:$0xff]  ;;  %v104_v10 = vld [vmem:[%s1486_s4 + $0x18] sm:$0xff] }
   0x6   :  { %v103_v11 = vld [vmem:[%s1486_s4 + $0x10] sm:$0xff] }
   0x9   :  { %79 = vperm.xlu1 %1119, %v70_v4   ;;  %52 = vperm.xlu0 %1118, %v43_v5  }
   0xd   :  { %84 = vperm.xlu1 %1119, %v71_v6   ;;  %57 = vperm.xlu0 %1118, %v44_v7  }
  0x11   :  { %116 = vperm.xlu1 %1119, %v102_v8   ;;  %111 = vperm.xlu0 %1118, %v101_v9  }
  0x12   :  { %18 = vsyncpa [#allocation4], 0  ;;  %v93_v12 = vld [vmem:[%s1485_s3] sm:$0xff]  ;;  %vm149_vm0 = vcmask 162816   ;;  %v106_v13 = vld [vmem:[%s1486_s4 + $0x28] sm:$0xff]  ;;  %vm174_vm1 = vcmask 1043456  }
  0x13   :  { %v105_v14 = vld [vmem:[%s1486_s4 + $0x20] sm:$0xff]  ;;  %968 = vmatprep.mubr.msk.f32.mxu0 %vm149_vm0, %v93_v12  ;;  %v108_v15 = vld [vmem:[%s1486_s4 + $0x38] sm:$0xff]  ;;  %v107_v16 = vld [vmem:[%s1486_s4 + $0x30] sm:$0xff]  ;;  %vm403_vm2 = vcmask 523264  }
  0x14   :  { %v308_v17 = vld [vmem:[%s1488_s6 + $0x8] sm:$0xff]  ;;  %v307_v18 = vld [vmem:[%s1488_s6] sm:$0xff]  ;;  %v310_v19 = vld [vmem:[%s1488_s6 + $0x18] sm:$0xff] }
  0x15   :  { %126 = vperm.xlu1 %1119, %v104_v10   ;;  %121 = vperm.xlu0 %1118, %v103_v11   ;;  %v309_v20 = vld [vmem:[%s1488_s6 + $0x10] sm:$0xff]  ;;  %v312_v21 = vld [vmem:[%s1488_s6 + $0x28] sm:$0xff]  ;;  %v311_v22 = vld [vmem:[%s1488_s6 + $0x20] sm:$0xff] }
  0x16   :  { %v314_v23 = vld [vmem:[%s1488_s6 + $0x38] sm:$0xff]  ;;  %v313_v24 = vld [vmem:[%s1488_s6 + $0x30] sm:$0xff]  ;;  %v316_v25 = vld [vmem:[%s1488_s6 + $0x48] sm:$0xff] }
  0x17   :  { %v315_v26 = vld [vmem:[%s1488_s6 + $0x40] sm:$0xff]  ;;  %v318_v27 = vld [vmem:[%s1488_s6 + $0x58] sm:$0xff]  ;;  %v317_v28 = vld [vmem:[%s1488_s6 + $0x50] sm:$0xff] }
  0x18   :  { %v320_v29 = vld [vmem:[%s1488_s6 + $0x68] sm:$0xff]  ;;  %v319_v30 = vld [vmem:[%s1488_s6 + $0x60] sm:$0xff]  ;;  %v322_v31 = vld [vmem:[%s1488_s6 + $0x78] sm:$0xff] }
  0x19   :  { %136 = vperm.xlu1 %1119, %v106_v13   ;;  %131 = vperm.xlu0 %1118, %v105_v14   ;;  %v321_v32 = vld [vmem:[%s1488_s6 + $0x70] sm:$0xff]  ;;  %v622_v33 = vld [vmem:[%s1490_s8 + $0x8] sm:$0xff]  ;;  %v621_v34 = vld [vmem:[%s1490_s8] sm:$0xff] }
  0x1a   :  { %v624_v35 = vld [vmem:[%s1490_s8 + $0x18] sm:$0xff]  ;;  %v623_v36 = vld [vmem:[%s1490_s8 + $0x10] sm:$0xff]  ;;  %v783_v37 = vld [vmem:[%s1491_s9 + $0x8] sm:$0xff] }
  0x1b   :  { %v782_v38 = vld [vmem:[%s1491_s9] sm:$0xff]  ;;  %v784_v39 = vld [vmem:[%s1491_s9 + $0x10] sm:$0xff]  ;;  %v785_v41 = vld [vmem:[%s1491_s9 + $0x18] sm:$0xff] }
  0x1c   :  { %v625_v40 = vld [vmem:[%s1490_s8 + $0x20] sm:$0xff]  ;;  %v626_v42 = vld [vmem:[%s1490_s8 + $0x28] sm:$0xff]  ;;  %v627_v44 = vld [vmem:[%s1490_s8 + $0x30] sm:$0xff] }
  0x1d   :  { %146 = vperm.xlu1 %1119, %v108_v15   ;;  %141 = vperm.xlu0 %1118, %v107_v16   ;;  %v786_v43 = vld [vmem:[%s1491_s9 + $0x20] sm:$0xff]  ;;  %v787_v45 = vld [vmem:[%s1491_s9 + $0x28] sm:$0xff]  ;;  %v628_v46 = vld [vmem:[%s1490_s8 + $0x38] sm:$0xff] }
  0x1e   :  { %v789_v47 = vld [vmem:[%s1491_s9 + $0x38] sm:$0xff]  ;;  %v788_v48 = vld [vmem:[%s1491_s9 + $0x30] sm:$0xff]  ;;  %v851_v49 = vld [vmem:[#allocation2] sm:$0x1] }
  0x1f   :  { %v877_v50 = vld [vmem:[%s1482_s0] ss:$0 sm:$0xff]  ;;  %v94_v3 = vld [vmem:[%s1485_s3 + $0x8] sm:$0xff]  ;;  %v95_v4 = vld [vmem:[%s1485_s3 + $0x10] sm:$0xff] }
  0x20   :  { %v96_v5 = vld [vmem:[%s1485_s3 + $0x18] sm:$0xff]  ;;  %v97_v6 = vld [vmem:[%s1485_s3 + $0x20] sm:$0xff]  ;;  %v98_v7 = vld [vmem:[%s1485_s3 + $0x28] sm:$0xff] }
  0x21   :  { %330 = vperm.xlu1 %1119, %v308_v17   ;;  %325 = vperm.xlu0 %1118, %v307_v18   ;;  %v99_v8 = vld [vmem:[%s1485_s3 + $0x30] sm:$0xff]  ;;  %v100_v9 = vld [vmem:[%s1485_s3 + $0x38] sm:$0xff]  ;;  %v291_v10 = vld [vmem:[%s1487_s5] sm:$0xff] }
  0x22   :  { %996 = vmatprep.mubr.msk.f32.mxu1 %vm403_vm2, %v291_v10 }
  0x25   :  { %340 = vperm.xlu1 %1119, %v310_v19   ;;  %335 = vperm.xlu0 %1118, %v309_v20  }
  0x29   :  { %350 = vperm.xlu1 %1119, %v312_v21   ;;  %345 = vperm.xlu0 %1118, %v311_v22  }
  0x2d   :  { %360 = vperm.xlu1 %1119, %v314_v23   ;;  %355 = vperm.xlu0 %1118, %v313_v24  }
  0x31   :  { %370 = vperm.xlu1 %1119, %v316_v25   ;;  %365 = vperm.xlu0 %1118, %v315_v26  }
  0x35   :  { %380 = vperm.xlu1 %1119, %v318_v27   ;;  %375 = vperm.xlu0 %1118, %v317_v28  }
  0x39   :  { %390 = vperm.xlu1 %1119, %v320_v29   ;;  %385 = vperm.xlu0 %1118, %v319_v30  }
  0x3d   :  { %400 = vperm.xlu1 %1119, %v322_v31   ;;  %395 = vperm.xlu0 %1118, %v321_v32  }
  0x41   :  { %636 = vperm.xlu1 %1119, %v622_v33   ;;  %631 = vperm.xlu0 %1118, %v621_v34  }
  0x45   :  { %646 = vperm.xlu1 %1119, %v624_v35   ;;  %641 = vperm.xlu0 %1118, %v623_v36  }
  0x49   :  { %797 = vperm.xlu1 %1119, %v783_v37   ;;  %792 = vperm.xlu0 %1118, %v782_v38  }
  0x4d   :  { %802 = vperm.xlu1 %1119, %v784_v39   ;;  %651 = vperm.xlu0 %1118, %v625_v40  }
  0x51   :  { %807 = vperm.xlu1 %1119, %v785_v41   ;;  %656 = vperm.xlu0 %1118, %v626_v42  }
  0x55   :  { %812 = vperm.xlu1 %1119, %v786_v43   ;;  %661 = vperm.xlu0 %1118, %v627_v44  }
  0x59   :  { %817 = vperm.xlu1 %1119, %v787_v45   ;;  %666 = vperm.xlu0 %1118, %v628_v46  }
  0x5d   :  { %827 = vperm.xlu1 %1119, %v789_v47   ;;  %822 = vperm.xlu0 %1118, %v788_v48   ;;  %v292_v47 = vld [vmem:[%s1487_s5 + $0x8] sm:$0xff]  ;;  %v293_v48 = vld [vmem:[%s1487_s5 + $0x10] sm:$0xff] }
  0x61   :  { %854 = vperm.xlu0 %1118, %v851_v49   ;;  %v294_v49 = vld [vmem:[%s1487_s5 + $0x18] sm:$0xff] }
  0x84   :  { %v75_v51 = vpop.permute.xlu1 %74  ;;  %v48_v52 = vpop.permute.xlu0 %47 }
  0x85   :  { %v66_v53 = vmul.f32 %v877_v50, %v48_v52  ;;  %v297_v52 = vld [vmem:[%s1487_s5 + $0x30] sm:$0xff] }
  0x87   :  { %v87_v56 = vadd.f32 %v75_v51, %v66_v53  ;;  %v296_v51 = vld [vmem:[%s1487_s5 + $0x28] sm:$0xff]  ;;  %v298_v53 = vld [vmem:[%s1487_s5 + $0x38] sm:$0xff] }
  0x88   :  { %v80_v54 = vpop.permute.xlu1 %79  ;;  %v53_v55 = vpop.permute.xlu0 %52 }
  0x89   :  { %v67_v57 = vmul.f32 %v877_v50, %v53_v55  ;;  %v90_v60 = vmax.f32 %v87_v56, 0.0  ;;  %v300_v55 = vld [vmem:[%s1487_s5 + $0x48] sm:$0xff]  ;;  %v301_v56 = vld [vmem:[%s1487_s5 + $0x50] sm:$0xff] }
  0x8b   :  { %v88_v58 = vadd.f32 %v80_v54, %v67_v57  ;;  %v299_v54 = vld [vmem:[%s1487_s5 + $0x40] sm:$0xff]  ;;  %v302_v57 = vld [vmem:[%s1487_s5 + $0x58] sm:$0xff] }
  0x8c   :  { %v58_v59 = vpop.permute.xlu0 %57  ;;  %v85_v63 = vpop.permute.xlu1 %84 }
  0x8d   :  { %v91_v61 = vmax.f32 %v88_v58, 0.0  ;;  %v68_v62 = vmul.f32 %v877_v50, %v58_v59  ;;  %v295_v50 = vld [vmem:[%s1487_s5 + $0x20] sm:$0xff]  ;;  %v304_v59 = vld [vmem:[%s1487_s5 + $0x68] sm:$0xff] }
  0x8e   :  { %v303_v58 = vld [vmem:[%s1487_s5 + $0x60] sm:$0xff] }
  0x8f   :  { %v89_v0 = vadd.f32 %v85_v63, %v68_v62  ;;  %v1064_v1 = vpack.c.bf16 %v91_v61, %v90_v60  ;;  %v305_v60 = vld [vmem:[%s1487_s5 + $0x70] sm:$0xff]  ;;  %v306_v61 = vld [vmem:[%s1487_s5 + $0x78] sm:$0xff]  ;;  %v613_v62 = vld [vmem:[%s1489_s7] sm:$0xff] }
  0x90   :  { %v117_v11 = vpop.permute.xlu1 %116  ;;  %v112_v12 = vpop.permute.xlu0 %111 }
  0x91   :  { %v92_v2 = vmax.f32 %v89_v0, 0.0  ;;  %1065 = vmatprep.subr.bf16.mxu0 %v1064_v1 }
  0x92   :  { %1067 = vmatpush3.bf16.msra.mxu0 %v1064_v1 }
  0x93   :  { %966 = vmatprep.subr.msk.mxu0 %vm174_vm1, %v92_v2 }
  0x94   :  { %v127_v13 = vpop.permute.xlu1 %126  ;;  %v122_v15 = vpop.permute.xlu0 %121 }
  0x96   :  { %967 = vmatpush3.msk.msra.mxu0 %vm174_vm1, %v92_v2 }
  0x97   :  { %969 = vmatmul.mubr.msk.f32.vlgmr.msra.gmra.mrb[0].mxu0 %vm149_vm0, %v94_v3 }
  0x98   :  { %971 = vmatprep.mubr.msk.f32.mxu0 %vm149_vm0, %v95_v4  ;;  %v137_v24 = vpop.permute.xlu1 %136  ;;  %v132_v27 = vpop.permute.xlu0 %131 }
  0x9b   :  { %972 = vmatmul.mubr.msk.f32.gmra.mrb[2].mxu0 %vm149_vm0, %v96_v5 }
  0x9c   :  { %974 = vmatprep.mubr.msk.f32.mxu0 %vm149_vm0, %v97_v6  ;;  %v147_v36 = vpop.permute.xlu1 %146  ;;  %v142_v39 = vpop.permute.xlu0 %141 }
  0x9f   :  { %975 = vmatmul.mubr.msk.f32.gmra.mrb[4].mxu0 %vm149_vm0, %v98_v7 }
  0xa0   :  { %977 = vmatprep.mubr.msk.f32.mxu0 %vm149_vm0, %v99_v8  ;;  %v331_v63 = vpop.permute.xlu1 %330  ;;  %v326_v0 = vpop.permute.xlu0 %325 }
  0xa3   :  { %978 = vmatmul.mubr.msk.f32.gmra.mrb[6].mxu0 %vm149_vm0, %v100_v9 }
  0xa4   :  { %1052 = vmatprep.mubr.f32.mxu0 %v613_v62  ;;  %v341_v1 = vpop.permute.xlu1 %340  ;;  %v336_v2 = vpop.permute.xlu0 %335 }
  0xa8   :  { %v351_v3 = vpop.permute.xlu1 %350  ;;  %v346_v4 = vpop.permute.xlu0 %345 }
  0xac   :  { %v361_v10 = vpop.permute.xlu1 %360 }
 0x16a   :  { %v970_v14 = vpop.f32.mrb[0].mxu0 }
 0x16b   :  { %v250_v16 = vadd.f32 %v970_v14, %v117_v11  ;;  %v244_v17 = vpop.f32.mrb[1].mxu0 }
 0x16c   :  { %v245_v18 = vadd.f32 %v244_v17, %v112_v12 }
 0x16d   :  { %v284_v19 = vmax.f32 %v250_v16, 0.0 }
 0x16e   :  { %v283_v20 = vmax.f32 %v245_v18, 0.0  ;;  %v973_v21 = vpop.f32.mrb[2].mxu0 }
 0x16f   :  { %v260_v22 = vadd.f32 %v973_v21, %v127_v13  ;;  %v254_v23 = vpop.f32.mrb[3].mxu0  ;;  %v356_v13 = vpop.permute.xlu0 %355 }
 0x170   :  { %v255_v25 = vadd.f32 %v254_v23, %v122_v15  ;;  %v1068_v26 = vpack.c.bf16 %v284_v19, %v283_v20  ;;  %v371_v23 = vpop.permute.xlu1 %370 }
 0x171   :  { %v286_v28 = vmax.f32 %v260_v22, 0.0 }
 0x172   :  { %v285_v29 = vmax.f32 %v255_v25, 0.0  ;;  %v976_v30 = vpop.f32.mrb[4].mxu0  ;;  %1069 = vmatprep.subr.bf16.mxu1 %v1068_v26 }
 0x173   :  { %v270_v31 = vadd.f32 %v976_v30, %v137_v24  ;;  %v264_v32 = vpop.f32.mrb[5].mxu0  ;;  %1071 = vmatpush3.bf16.msra.mxu1 %v1068_v26  ;;  %v366_v26 = vpop.permute.xlu0 %365 }
 0x174   :  { %v1072_v33 = vpack.c.bf16 %v286_v28, %v285_v29  ;;  %v265_v34 = vadd.f32 %v264_v32, %v132_v27 }
 0x175   :  { %v288_v35 = vmax.f32 %v270_v31, 0.0 }
 0x176   :  { %v287_v37 = vmax.f32 %v265_v34, 0.0  ;;  %v979_v38 = vpop.f32.mrb[6].mxu0  ;;  %1073 = vmatprep.subr.bf16.mxu1 %v1072_v33 }
 0x177   :  { %v280_v40 = vadd.f32 %v979_v38, %v147_v36  ;;  %v274_v41 = vpop.f32.mrb[7].mxu0  ;;  %1075 = vmatpush3.bf16.msra.mxu1 %v1072_v33  ;;  %v376_v38 = vpop.permute.xlu0 %375 }
 0x178   :  { %v1076_v42 = vpack.c.bf16 %v288_v35, %v287_v37  ;;  %v275_v43 = vadd.f32 %v274_v41, %v142_v39  ;;  %v381_v35 = vpop.permute.xlu1 %380 }
 0x179   :  { %v290_v44 = vmax.f32 %v280_v40, 0.0 }
 0x17a   :  { %v289_v45 = vmax.f32 %v275_v43, 0.0  ;;  %1077 = vmatprep.subr.bf16.mxu1 %v1076_v42 }
 0x17b   :  { %1079 = vmatpush3.bf16.msra.mxu1 %v1076_v42 }
 0x17c   :  { %v1080_v46 = vpack.c.bf16 %v290_v44, %v289_v45 }
 0x17e   :  { %1081 = vmatprep.subr.bf16.mxu1 %v1080_v46 }
 0x17f   :  { %1083 = vmatpush3.bf16.msra.mxu1 %v1080_v46 }
 0x182   :  { %997 = vmatmul.mubr.msk.f32.vlgmr.msra.gmra.mrb[0].mxu1 %vm403_vm2, %v292_v47 }
 0x183   :  { %999 = vmatprep.mubr.msk.f32.mxu1 %vm403_vm2, %v293_v48  ;;  %v391_v48 = vpop.permute.xlu1 %390 }
 0x186   :  { %1000 = vmatmul.mubr.msk.f32.gmra.mrb[2].mxu1 %vm403_vm2, %v294_v49 }
 0x187   :  { %1002 = vmatprep.mubr.msk.f32.mxu1 %vm403_vm2, %v295_v50 }
 0x18a   :  { %1003 = vmatmul.mubr.msk.f32.gmra.mrb[4].mxu1 %vm403_vm2, %v296_v51  ;;  %v386_v51 = vpop.permute.xlu0 %385 }
 0x18b   :  { %1005 = vmatprep.mubr.msk.f32.mxu1 %vm403_vm2, %v297_v52 }
 0x18e   :  { %1006 = vmatmul.mubr.msk.f32.gmra.mrb[6].mxu1 %vm403_vm2, %v298_v53 }
 0x18f   :  { %1008 = vmatprep.mubr.msk.f32.mxu1 %vm403_vm2, %v299_v54 }
 0x192   :  { %1009 = vmatmul.mubr.msk.f32.gmra.mrb[8].mxu1 %vm403_vm2, %v300_v55 }
 0x193   :  { %1011 = vmatprep.mubr.msk.f32.mxu1 %vm403_vm2, %v301_v56 }
 0x196   :  { %1012 = vmatmul.mubr.msk.f32.gmra.mrb[10].mxu1 %vm403_vm2, %v302_v57 }
 0x197   :  { %1014 = vmatprep.mubr.msk.f32.mxu1 %vm403_vm2, %v303_v58 }
 0x19a   :  { %1015 = vmatmul.mubr.msk.f32.gmra.mrb[12].mxu1 %vm403_vm2, %v304_v59 }
 0x19b   :  { %1017 = vmatprep.mubr.msk.f32.mxu1 %vm403_vm2, %v305_v60  ;;  %v401_v60 = vpop.permute.xlu1 %400 }
 0x19e   :  { %1018 = vmatmul.mubr.msk.f32.gmra.mrb[14].mxu1 %vm403_vm2, %v306_v61 }
 0x255   :  { %v998_v5 = vpop.f32.mrb[0].mxu1 }
 0x256   :  { %v524_v6 = vadd.f32 %v998_v5, %v331_v63  ;;  %v518_v7 = vpop.f32.mrb[1].mxu1  ;;  %v396_v63 = vpop.permute.xlu0 %395 }
 0x257   :  { %v519_v8 = vadd.f32 %v518_v7, %v326_v0  ;;  %v614_v7 = vld [vmem:[%s1489_s7 + $0x8] sm:$0xff] }
 0x258   :  { %v598_v9 = vmax.f32 %v524_v6, 0.0 }
 0x259   :  { %v597_v11 = vmax.f32 %v519_v8, 0.0  ;;  %v1001_v12 = vpop.f32.mrb[2].mxu1  ;;  %v615_v8 = vld [vmem:[%s1489_s7 + $0x10] sm:$0xff] }
 0x25a   :  { %v534_v14 = vadd.f32 %v1001_v12, %v341_v1  ;;  %v528_v15 = vpop.f32.mrb[3].mxu1  ;;  %v619_v12 = vld [vmem:[%s1489_s7 + $0x30] sm:$0xff] }
 0x25b   :  { %v1084_v16 = vpack.c.bf16 %v598_v9, %v597_v11  ;;  %v529_v17 = vadd.f32 %v528_v15, %v336_v2  ;;  %v616_v9 = vld [vmem:[%s1489_s7 + $0x18] sm:$0xff]  ;;  %v618_v11 = vld [vmem:[%s1489_s7 + $0x28] sm:$0xff]  ;;  %v637_v15 = vpop.permute.xlu1 %636 }
 0x25c   :  { %v600_v18 = vmax.f32 %v534_v14, 0.0  ;;  %v632_v14 = vpop.permute.xlu0 %631 }
 0x25d   :  { %v599_v19 = vmax.f32 %v529_v17, 0.0  ;;  %v1004_v20 = vpop.f32.mrb[4].mxu1  ;;  %1085 = vmatprep.subr.bf16.mxu0 %v1084_v16 }
 0x25e   :  { %v544_v21 = vadd.f32 %v1004_v20, %v351_v3  ;;  %v538_v22 = vpop.f32.mrb[5].mxu1  ;;  %1087 = vmatpush3.bf16.msra.mxu0 %v1084_v16 }
 0x25f   :  { %v1088_v24 = vpack.c.bf16 %v600_v18, %v599_v19  ;;  %v539_v25 = vadd.f32 %v538_v22, %v346_v4  ;;  %v647_v17 = vpop.permute.xlu1 %646 }
 0x260   :  { %v602_v27 = vmax.f32 %v544_v21, 0.0  ;;  %v642_v16 = vpop.permute.xlu0 %641 }
 0x261   :  { %v601_v28 = vmax.f32 %v539_v25, 0.0  ;;  %v1007_v29 = vpop.f32.mrb[6].mxu1  ;;  %1089 = vmatprep.subr.bf16.mxu0 %v1088_v24 }
 0x262   :  { %v554_v30 = vadd.f32 %v1007_v29, %v361_v10  ;;  %v548_v31 = vpop.f32.mrb[7].mxu1  ;;  %1091 = vmatpush3.bf16.msra.mxu0 %v1088_v24  ;;  %v617_v10 = vld [vmem:[%s1489_s7 + $0x20] sm:$0xff] }
 0x263   :  { %v1092_v32 = vpack.c.bf16 %v602_v27, %v601_v28  ;;  %v549_v33 = vadd.f32 %v548_v31, %v356_v13  ;;  %v620_v13 = vld [vmem:[%s1489_s7 + $0x38] sm:$0xff]  ;;  %v798_v19 = vpop.permute.xlu1 %797  ;;  %s1145_s7 = smov [#allocation3]  }
 0x264   :  { %v604_v34 = vmax.f32 %v554_v30, 0.0  ;;  %v793_v18 = vpop.permute.xlu0 %792  ;;  %s869_s24 = sshll.u32 %s1145_s7, 4  ;;  %s870_s24 = int_to_ptr.vmem [resolvable:$true] %s869_s24 }
 0x265   :  { %v603_v36 = vmax.f32 %v549_v33, 0.0  ;;  %v1010_v37 = vpop.f32.mrb[8].mxu1  ;;  %1093 = vmatprep.subr.bf16.mxu0 %v1092_v32  ;;  %s1120_s25 = scalar_lea.vmem %s870_s24, 16  ;;  %s1124_s10 = scalar_lea.vmem %s870_s24, 32 }
 0x266   :  { %v564_v39 = vadd.f32 %v1010_v37, %v371_v23  ;;  %v558_v40 = vpop.f32.mrb[9].mxu1  ;;  %1095 = vmatpush3.bf16.msra.mxu0 %v1092_v32  ;;  %p1121_p0 = scmp.ne.s32.totalorder %s870_s24, %s1120_s25  ;;  %p1125_p1 = scmp.lt.s32.totalorder %s870_s24, %s870_s24 }
 0x267   :  { %v1096_v41 = vpack.c.bf16 %v604_v34, %v603_v36  ;;  %v559_v42 = vadd.f32 %v558_v40, %v366_v26  ;;  %v803_v21 = vpop.permute.xlu1 %802  ;;  %p1126_p2 = scmp.lt.s32.totalorder %s1124_s10, %s1120_s25 }
 0x268   :  { %v606_v43 = vmax.f32 %v564_v39, 0.0  ;;  %v652_v20 = vpop.permute.xlu0 %651 }
 0x269   :  { %v605_v44 = vmax.f32 %v559_v42, 0.0  ;;  %v1013_v45 = vpop.f32.mrb[10].mxu1  ;;  %1097 = vmatprep.subr.bf16.mxu0 %v1096_v41  ;;  %p1127_p3 = por %p1126_p2, %p1125_p1 }
 0x26a   :  { %v574_v46 = vadd.f32 %v1013_v45, %v381_v35  ;;  %v568_v47 = vpop.f32.mrb[11].mxu1  ;;  %1099 = vmatpush3.bf16.msra.mxu0 %v1096_v41 }
 0x26b   :  { %v1100_v49 = vpack.c.bf16 %v606_v43, %v605_v44  ;;  %v569_v50 = vadd.f32 %v568_v47, %v376_v38  ;;  %v808_v24 = vpop.permute.xlu1 %807  ;;  %p1128_p4 = pnand %p1127_p3, %p1121_p0 }
 0x26c   :  { %v608_v52 = vmax.f32 %v574_v46, 0.0  ;;  %v657_v22 = vpop.permute.xlu0 %656 }
 0x26d   :  { %v607_v53 = vmax.f32 %v569_v50, 0.0  ;;  %v1016_v54 = vpop.f32.mrb[12].mxu1  ;;  %1101 = vmatprep.subr.bf16.mxu0 %v1100_v49 }
 0x26e   :  { %v584_v55 = vadd.f32 %v1016_v54, %v391_v48  ;;  %v578_v56 = vpop.f32.mrb[13].mxu1  ;;  %1103 = vmatpush3.bf16.msra.mxu0 %v1100_v49 }
 0x26f   :  { %v1104_v57 = vpack.c.bf16 %v608_v52, %v607_v53  ;;  %v579_v58 = vadd.f32 %v578_v56, %v386_v51  ;;  %v813_v37 = vpop.permute.xlu1 %812 }
 0x270   :  { %v610_v59 = vmax.f32 %v584_v55, 0.0  ;;  %v662_v31 = vpop.permute.xlu0 %661 }
 0x271   :  { %v609_v61 = vmax.f32 %v579_v58, 0.0  ;;  %v1019_v62 = vpop.f32.mrb[14].mxu1  ;;  %1105 = vmatprep.subr.bf16.mxu0 %v1104_v57 }
 0x272   :  { %v594_v0 = vadd.f32 %v1019_v62, %v401_v60  ;;  %v588_v1 = vpop.f32.mrb[15].mxu1  ;;  %1107 = vmatpush3.bf16.msra.mxu0 %v1104_v57 }
 0x273   :  { %v1108_v2 = vpack.c.bf16 %v610_v59, %v609_v61  ;;  %v589_v3 = vadd.f32 %v588_v1, %v396_v63  ;;  %v818_v52 = vpop.permute.xlu1 %817 }
 0x274   :  { %v612_v4 = vmax.f32 %v594_v0, 0.0  ;;  %v667_v46 = vpop.permute.xlu0 %666 }
 0x275   :  { %v611_v5 = vmax.f32 %v589_v3, 0.0  ;;  %1109 = vmatprep.subr.bf16.mxu0 %v1108_v2 }
 0x276   :  { %1111 = vmatpush3.bf16.msra.mxu0 %v1108_v2 }
 0x277   :  { %v1112_v6 = vpack.c.bf16 %v612_v4, %v611_v5  ;;  %v828_v1 = vpop.permute.xlu1 %827  ;;  %v857_v4 = vlaneseq }
 0x278   :  { %v823_v62 = vpop.permute.xlu0 %822 }
 0x279   :  { %1113 = vmatprep.subr.bf16.mxu0 %v1112_v6 }
 0x27a   :  { %1115 = vmatpush3.bf16.msra.mxu0 %v1112_v6 }
 0x27d   :  { %1053 = vmatmul.mubr.f32.vlgmr.msra.gmra.mrb[8].mxu0 %v614_v7  ;;  %v858_v7 = vshrl.u32 %v857_v4, 7 }
 0x27e   :  { %1055 = vmatprep.mubr.f32.mxu0 %v615_v8 }
 0x281   :  { %1056 = vmatmul.mubr.f32.gmra.mrb[10].mxu0 %v616_v9 }
 0x282   :  { %1058 = vmatprep.mubr.f32.mxu0 %v617_v10  ;;  %v859_v10 = vsub.s32 0, %v858_v7 }
 0x285   :  { %1059 = vmatmul.mubr.f32.gmra.mrb[12].mxu0 %v618_v11 }
 0x286   :  { %1061 = vmatprep.mubr.f32.mxu0 %v619_v12  ;;  %v855_v12 = vpop.permute.xlu0 %854 }
 0x289   :  { %1062 = vmatmul.mubr.f32.gmra.mrb[14].mxu0 %v620_v13 }
 0x350   :  { %v1054_v23 = vpop.f32.mrb[8].mxu0 }
 0x351   :  { %v741_v25 = vadd.f32 %v1054_v23, %v637_v15  ;;  %v735_v26 = vpop.f32.mrb[9].mxu0 }
 0x352   :  { %v736_v27 = vadd.f32 %v735_v26, %v632_v14  ;;  %v860_v14 = vrot.slane %v855_v12, %v859_v10 }
 0x353   :  { %v775_v28 = vmax.f32 %v741_v25, 0.0 }
 0x354   :  { %v774_v29 = vmax.f32 %v736_v27, 0.0  ;;  %v1057_v30 = vpop.f32.mrb[10].mxu0 }
 0x355   :  { %v831_v32 = vmul.f32 %v798_v19, %v775_v28  ;;  %v751_v33 = vadd.f32 %v1057_v30, %v647_v17  ;;  %v745_v34 = vpop.f32.mrb[11].mxu0 }
 0x356   :  { %v830_v35 = vmul.f32 %v793_v18, %v774_v29  ;;  %v746_v36 = vadd.f32 %v745_v34, %v642_v16 }
 0x357   :  { %v777_v39 = vmax.f32 %v751_v33, 0.0 }
 0x358   :  { %v838_v38 = vadd.f32 %v831_v32, %v830_v35  ;;  %v776_v40 = vmax.f32 %v746_v36, 0.0  ;;  %v1060_v41 = vpop.f32.mrb[12].mxu0 }
 0x359   :  { %v761_v42 = vadd.f32 %v1060_v41, %v657_v22  ;;  %v755_v43 = vpop.f32.mrb[13].mxu0  ;;  %v833_v47 = vmul.f32 %v808_v24, %v777_v39 }
 0x35a   :  { %v832_v44 = vmul.f32 %v803_v21, %v776_v40  ;;  %v756_v45 = vadd.f32 %v755_v43, %v652_v20 }
 0x35b   :  { %v779_v49 = vmax.f32 %v761_v42, 0.0 }
 0x35c   :  { %v839_v48 = vadd.f32 %v838_v38, %v832_v44  ;;  %v778_v50 = vmax.f32 %v756_v45, 0.0  ;;  %v1063_v51 = vpop.f32.mrb[14].mxu0 }
 0x35d   :  { %v771_v53 = vadd.f32 %v1063_v51, %v667_v46  ;;  %v765_v54 = vpop.f32.mrb[15].mxu0  ;;  %v835_v58 = vmul.f32 %v818_v52, %v779_v49 }
 0x35e   :  { %v834_v55 = vmul.f32 %v813_v37, %v778_v50  ;;  %v840_v56 = vadd.f32 %v839_v48, %v833_v47  ;;  %v766_v57 = vadd.f32 %v765_v54, %v662_v31 }
 0x35f   :  { %v781_v60 = vmax.f32 %v771_v53, 0.0 }
 0x360   :  { %v841_v59 = vadd.f32 %v840_v56, %v834_v55  ;;  %v780_v61 = vmax.f32 %v766_v57, 0.0 }
 0x361   :  { %v837_v2 = vmul.f32 %v828_v1, %v781_v60 }
 0x362   :  { %v836_v63 = vmul.f32 %v823_v62, %v780_v61  ;;  %v842_v0 = vadd.f32 %v841_v59, %v835_v58 }
 0x364   :  { %v843_v3 = vadd.f32 %v842_v0, %v836_v63 }
 0x366   :  { %v844_v5 = vadd.f32 %v843_v3, %v837_v2 }
 0x368   :  { %v845_v6 = vrot.slane %v844_v5, 4 }
 0x36a   :  { %v846_v8 = vadd.f32 %v845_v6, %v844_v5 }
 0x36c   :  { %v847_v9 = vrot.slane %v846_v8, 2 }
 0x36e   :  { %v848_v11 = vadd.f32 %v847_v9, %v846_v8 }
 0x370   :  { %v849_v13 = vrot.slane %v848_v11, 1 }
 0x372   :  { %v850_v15 = vadd.f32 %v849_v13, %v848_v11 }
 0x374   :  { %v861_v16 = vadd.f32 %v860_v14, %v850_v15 }
 0x376   :  { %862 = vst [vmem:[#allocation3] sm:$0x1] %v861_v16 }
 0x377   :  { %1131 = shalt.err (!%p1128_p4)
}
 0x378   :  { %s1132_s28 = scalar_lea.hbm %s1493_s11, 16 }
 0x379   :  { %p1133_p5 = scmp.ne.s32.totalorder %s1493_s11, %s1132_s28  ;;  %p1136_p6 = scmp.lt.u32.totalorder %s1132_s28, %s1493_s11 }
 0x37b   :  { %p1138_p7 = pnand %p1136_p6, %p1133_p5 }
 0x37d   :  { %1141 = shalt.err (!%p1138_p7)
}
 0x37e   :  { %872 = dma.vmem_to_hbm [thread:$0]  %s870_s24, 16, %s1493_s11, [#allocation4]  }
 0x37f   :  { %1142 = dma.done.wait [#allocation4], 16  }
 0x380   :  { %1143 = vsyncadd [#allocation4], 4294967280 }
 0x381   :  { %876 = vsyncpa [#allocation4], 1 }

</bundles_post_ra>
